<compile_context>
chip_gen: v6e
topology: v6e:2x2x1
jax: 0.10.0
libtpu: 0.0.40
codegen_flags: <defaults>
</compile_context>

<pallas_src>
import functools

import jax
import jax.numpy as jnp
from jax import lax
from jax.experimental import pallas as pl
from jax.experimental.pallas import tpu as pltpu


def _round_up(x, m):
    return (x + m - 1) // m * m


def _cdiv(a, b):
    return (a + b - 1) // b


def _tpu_defaults():
    """Per-generation (token_tile, vmem_limit_bytes, prefer>=2 token tiles)."""
    kind = ""
    try:
        kind = jax.devices()[0].device_kind.lower()
    except Exception:
        pass
    vmem_cap = None
    try:
        vmem_cap = int(pltpu.get_tpu_info().vmem_capacity_bytes)
    except Exception:
        vmem_cap = None
    is_v7 = ("7" in kind) or (vmem_cap is not None and vmem_cap <= 64 * 1024 * 1024)
    if vmem_cap is None:
        vmem_cap = 64 * 1024 * 1024 if is_v7 else 128 * 1024 * 1024
    if is_v7:
        tm, prefer_two = 512, True          # 64 MiB VMEM, 2 TensorCores per chip
    elif "v6" in kind:
        tm, prefer_two = 1024, False        # weight-DMA/compute crossover ~tm=680
    elif "v5" in kind:
        tm, prefer_two = 512, False
    else:
        tm, prefer_two = 512, False
    return tm, int(vmem_cap * 0.85), prefer_two


# ---------------------------------------------------------------------------
# Fused kernel: grid (token_tiles, num_experts, H_chunks).
#   (e, h) == (0, 0): zero the output block, compute gate logits -> top-k -> softmax
#                     routing weights into a VMEM scratch (kept for the whole tile).
#   every step      : bf16 FFN for expert e on H-chunk h, scaled by that expert's
#                     routing weight and accumulated into the f32 output block.
# ---------------------------------------------------------------------------
def _moe_kernel(x_ref, wg_ref, bg_ref, w1_ref, b1_ref, w2_ref, b2_ref,
                o_ref, mask_ref, *, topk, n_h):
    e = pl.program_id(1)
    hi = pl.program_id(2)

    @pl.when(jnp.logical_and(e == 0, hi == 0))
    def _():
        o_ref[...] = jnp.zeros_like(o_ref)
        # ---- fused gating (f32): logits, iterative top-k, softmax over the selected ----
        xg = x_ref[...].astype(jnp.float32)                              # [tm, D]
        g = jnp.dot(xg, wg_ref[...], preferred_element_type=jnp.float32) + bg_ref[...]
        tm, E = g.shape
        col = lax.broadcasted_iota(jnp.int32, (tm, E), 1)
        work = g
        sel = jnp.zeros((tm, E), jnp.bool_)
        for _ in range(topk):                                            # static unroll over k
            m = jnp.max(work, axis=-1, keepdims=True)
            is_max = work == m
            # first (lowest-index) maximum, matching torch.topk tie-breaking
            min_idx = jnp.min(jnp.where(is_max, col, E), axis=-1, keepdims=True)
            first = col == min_idx
            sel = jnp.logical_or(sel, first)
            work = jnp.where(first, -jnp.inf, work)
        mmax = jnp.max(jnp.where(sel, g, -jnp.inf), axis=-1, keepdims=True)
        p = jnp.where(sel, jnp.exp(g - mmax), 0.0)
        mask_ref[...] = p / jnp.sum(p, axis=-1, keepdims=True)           # [tm, E]

    # ---- routing weight of the current expert for every token (exactly 0 if unrouted).
    # E is lane-sparse; this select + lane-reduce runs on VPU/XLU slots that idle while
    # the MXU does the FFN matmuls below, so it is effectively free.
    mask = mask_ref[...]
    col = lax.broadcasted_iota(jnp.int32, mask.shape, 1)
    w = jnp.sum(jnp.where(col == e, mask, 0.0), axis=-1, keepdims=True)  # [tm, 1]

    # ---- expert FFN, H-chunked: bf16 MXU matmuls, f32 bias / GELU / accumulation ----
    xb = x_ref[...]                                                      # bf16 [tm, D]
    hact = jnp.dot(xb, w1_ref[0], preferred_element_type=jnp.float32)
    hact = hact + b1_ref[e * n_h + hi]                                   # resident b1 chunk
    hact = jax.nn.gelu(hact)
    y = jnp.dot(hact.astype(w2_ref.dtype), w2_ref[0],
                preferred_element_type=jnp.float32)                      # [tm, D]

    @pl.when(hi == 0)
    def _():
        o_ref[...] += w * b2_ref[e]          # output bias added once per expert

    o_ref[...] += w * y


# ---------------------------------------------------------------------------
# Wrapper
# ---------------------------------------------------------------------------
def moe_block(x, params, *, topk=2, tm=None, hc=1024):
    """x: [..., D] -> [..., D]."""
    wg, bg, w1, b1, w2, b2 = (params[k] for k in ("wg", "bg", "w1", "b1", "w2", "b2"))
    orig_shape = x.shape
    orig_dtype = x.dtype
    D = orig_shape[-1]
    E, _, H = w1.shape
    assert topk <= E

    tm_default, vmem_limit, prefer_two = _tpu_defaults()
    if tm is None:
        tm = tm_default

    # Tokens flattened; x fed in bf16 (the gate is re-upcast to f32 inside the kernel).
    xf = x.reshape(-1, D).astype(jnp.bfloat16)
    T = xf.shape[0]

    # Generation-sized token tile, clamped for tiny inputs; on 2-TensorCore chips keep at
    # least two token tiles so the "parallel" token axis can shard across both cores.
    if prefer_two and T > 256:
        tm = min(tm, _round_up(_cdiv(T, 2), 8))
    tm = min(tm, _round_up(T, 8))
    T_pad = _round_up(T, tm)

    # Lane-dense padding (multiple of 128) of D / H, and H-chunking so streamed weight
    # blocks stay bounded independently of H (v7x's 64 MiB VMEM budget).
    D_pad = _round_up(D, 128)
    H_pad = _round_up(H, 128)
    n_h = max(1, _cdiv(H_pad, hc))
    hc = _round_up(_cdiv(H_pad, n_h), 128)
    H_pad = n_h * hc

    xf = jnp.pad(xf, ((0, T_pad - T), (0, D_pad - D)))
    wgp = jnp.pad(wg.astype(jnp.float32), ((0, D_pad - D), (0, 0)))
    bgp = bg.astype(jnp.float32)
    w1p = jnp.pad(w1, ((0, 0), (0, D_pad - D), (0, H_pad - H))).astype(jnp.bfloat16)
    w2p = jnp.pad(w2, ((0, 0), (0, H_pad - H), (0, D_pad - D))).astype(jnp.bfloat16)
    # b1 reshaped so row (e*n_h + h) is expert e's h-th H-chunk bias (kept VMEM-resident).
    b1p = jnp.pad(b1.astype(jnp.float32), ((0, 0), (0, 0), (0, H_pad - H)))
    b1p = b1p.reshape(E, 1, n_h, hc).transpose(0, 2, 1, 3).reshape(E * n_h, 1, hc)
    b2p = jnp.pad(b2.astype(jnp.float32), ((0, 0), (0, 0), (0, D_pad - D)))

    grid = (T_pad // tm, E, n_h)   # expert / H axes innermost: x, gate, biases stay resident

    out = pl.pallas_call(
        functools.partial(_moe_kernel, topk=topk, n_h=n_h),
        out_shape=jax.ShapeDtypeStruct((T_pad, D_pad), jnp.float32),
        grid_spec=pltpu.PrefetchScalarGridSpec(
            num_scalar_prefetch=0,
            grid=grid,
            in_specs=[
                pl.BlockSpec((tm, D_pad), lambda t, e, h: (t, 0)),           # x (bf16)
                pl.BlockSpec((D_pad, E), lambda t, e, h: (0, 0)),            # gate W, resident
                pl.BlockSpec((1, E), lambda t, e, h: (0, 0)),                # gate b, resident
                pl.BlockSpec((1, D_pad, hc), lambda t, e, h: (e, 0, h)),     # W1[e, :, h-chunk]
                pl.BlockSpec((E * n_h, 1, hc), lambda t, e, h: (0, 0, 0)),   # b1, fully resident
                pl.BlockSpec((1, hc, D_pad), lambda t, e, h: (e, h, 0)),     # W2[e, h-chunk, :]
                pl.BlockSpec((E, 1, D_pad), lambda t, e, h: (0, 0, 0)),      # b2, fully resident
            ],
            out_specs=pl.BlockSpec((tm, D_pad), lambda t, e, h: (t, 0)),     # f32 in-place acc
            scratch_shapes=[
                pltpu.VMEM((tm, E), jnp.float32),                            # routing weights
            ],
        ),
        compiler_params=pltpu.CompilerParams(
            dimension_semantics=("parallel", "arbitrary", "arbitrary"),
            vmem_limit_bytes=vmem_limit,
        ),
    )(xf, wgp, bgp, w1p, b1p, w2p, b2p)

    out = out[:T, :D].reshape(orig_shape)
    return out if out.dtype == orig_dtype else out.astype(orig_dtype)


# ---------------------------------------------------------------------------
# Pure-JAX reference (f32, same routing semantics) for a correctness check
# ---------------------------------------------------------------------------
def moe_ref(x, params, *, topk=2):
    wg, bg, w1, b1, w2, b2 = (params[k] for k in ("wg", "bg", "w1", "b1", "w2", "b2"))
    orig_shape = x.shape
    xf = x.reshape(-1, orig_shape[-1]).astype(jnp.float32)
    g = jnp.dot(xf, wg, precision=lax.Precision.HIGHEST) + bg[0]          # [T, E]
    vals, idx = jax.lax.top_k(g, topk)                                    # sorted, low-index ties
    wts = jax.nn.softmax(vals, axis=-1)
    mask = jnp.zeros_like(g)
    mask = mask.at[jnp.arange(g.shape[0])[:, None], idx].set(wts)
    out = jnp.zeros_like(xf)
    for e in range(g.shape[-1]):
        h = jax.nn.gelu(jnp.dot(xf, w1[e], precision=lax.Precision.HIGHEST) + b1[e, 0])
        y = jnp.dot(h, w2[e], precision=lax.Precision.HIGHEST) + b2[e, 0]
        out = out + mask[:, e:e + 1] * y
    return out.reshape(orig_shape).astype(x.dtype)


if __name__ == "__main__":
    B, S, D = 2, 8, 32          # batch, seq, embed_dim
    E, H, TOPK = 4, 64, 2       # num_experts, expert hidden dim, topk

    key = jax.random.PRNGKey(0)
    ks = jax.random.split(key, 8)
    scale = 0.02
    params = {
        "wg": scale * jax.random.normal(ks[0], (D, E), jnp.float32),
        "bg": scale * jax.random.normal(ks[1], (1, E), jnp.float32),
        "w1": scale * jax.random.normal(ks[2], (E, D, H), jnp.float32),
        "b1": scale * jax.random.normal(ks[3], (E, 1, H), jnp.float32),
        "w2": scale * jax.random.normal(ks[4], (E, H, D), jnp.float32),
        "b2": scale * jax.random.normal(ks[5], (E, 1, D), jnp.float32),
    }
    x = jax.random.normal(ks[6], (B, S, D), jnp.float32)
    # Quantize x through bf16 once so the bf16-fed kernel and the f32 reference see the
    # exact same values (routing / top-k decisions cannot diverge on near-ties).
    x = x.astype(jnp.bfloat16).astype(jnp.float32)

    out = jax.block_until_ready(moe_block(x, params, topk=TOPK))
    ref = moe_ref(x, params, topk=TOPK)

    assert out.shape == x.shape
    # bf16 MXU inputs with f32 accumulation vs a pure-f32 reference -> loosened tolerance.
    assert jnp.allclose(out, ref, atol=5e-3, rtol=5e-2), "mismatch vs reference"

    print("KERNEL_OK")
</pallas_src>

<mosaic_0001>
module attributes {stable_mosaic.version = 11 : i64} {
  func.func @_moe_kernel(%arg0: i32, %arg1: i32, %arg2: i32, %arg3: memref<16x128xbf16, #tpu.memory_space<vmem>>, %arg4: memref<128x4xf32, #tpu.memory_space<vmem>>, %arg5: memref<1x4xf32, #tpu.memory_space<vmem>>, %arg6: memref<1x128x128xbf16, #tpu.memory_space<vmem>>, %arg7: memref<4x1x128xf32, #tpu.memory_space<vmem>>, %arg8: memref<1x128x128xbf16, #tpu.memory_space<vmem>>, %arg9: memref<4x1x128xf32, #tpu.memory_space<vmem>>, %arg10: memref<16x128xf32, #tpu.memory_space<vmem>>, %arg11: memref<16x4xf32, #tpu.memory_space<vmem>>) attributes {dimension_semantics = [#tpu.dimension_semantics<parallel>, #tpu.dimension_semantics<arbitrary>, #tpu.dimension_semantics<arbitrary>], iteration_bounds = array<i64: 1, 4, 1>, scalar_prefetch = 0 : i64, scratch_operands = 1 : i64, tpu.core_type = #tpu.core_type<tc>, window_params = [{transform_indices = @transform_0, window_bounds = array<i64: 16, 128>}, {pipeline_mode = #tpu.pipeline_mode<synchronous>, transform_indices = @transform_1, window_bounds = array<i64: 128, 4>}, {pipeline_mode = #tpu.pipeline_mode<synchronous>, transform_indices = @transform_2, window_bounds = array<i64: 1, 4>}, {transform_indices = @transform_3, window_bounds = array<i64: 1, 128, 128>}, {pipeline_mode = #tpu.pipeline_mode<synchronous>, transform_indices = @transform_4, window_bounds = array<i64: 4, 1, 128>}, {transform_indices = @transform_5, window_bounds = array<i64: 1, 128, 128>}, {pipeline_mode = #tpu.pipeline_mode<synchronous>, transform_indices = @transform_6, window_bounds = array<i64: 4, 1, 128>}, {transform_indices = @transform_7, window_bounds = array<i64: 16, 128>}]} {
    %c0_i32 = arith.constant 0 : i32
    %0 = arith.cmpi eq, %arg1, %c0_i32 : i32
    %c0_i32_0 = arith.constant 0 : i32
    %1 = arith.cmpi eq, %arg2, %c0_i32_0 : i32
    %2 = arith.andi %0, %1 : i1
    %3 = arith.extui %2 : i1 to i32
    %c0_i32_1 = arith.constant 0 : i32
    %4 = arith.cmpi ne, %3, %c0_i32_1 : i32
    scf.if %4 {
      %cst_26 = arith.constant 0.000000e+00 : f32
      %49 = vector.broadcast %cst_26 : f32 to vector<16x128xf32>
      %c0_27 = arith.constant 0 : index
      %c0_28 = arith.constant 0 : index
      %50 = vector.load %arg10[%c0_27, %c0_28] : memref<16x128xf32, #tpu.memory_space<vmem>>, vector<16x128xf32>
      tpu.vector_store %arg10[%c0_27, %c0_28], %49 {strides = array<i32>} : memref<16x128xf32, #tpu.memory_space<vmem>>, vector<16x128xf32>,
      %c0_29 = arith.constant 0 : index
      %c0_30 = arith.constant 0 : index
      %51 = vector.load %arg3[%c0_29, %c0_30] : memref<16x128xbf16, #tpu.memory_space<vmem>>, vector<16x128xbf16>
      %52 = arith.extf %51 : vector<16x128xbf16> to vector<16x128xf32>
      %c0_31 = arith.constant 0 : index
      %c0_32 = arith.constant 0 : index
      %53 = vector.load %arg4[%c0_31, %c0_32] : memref<128x4xf32, #tpu.memory_space<vmem>>, vector<128x4xf32>
      %cst_33 = arith.constant dense<0.000000e+00> : vector<16x4xf32>
      %54 = tpu.matmul %52, %53, %cst_33 {dimension_numbers = #tpu.dot_dimension_numbers<[1], [0], [0], [1], [0, 0, 1, 1], [], []>} : vector<16x128xf32>, vector<128x4xf32>, vector<16x4xf32> -> vector<16x4xf32>
      %c0_34 = arith.constant 0 : index
      %c0_35 = arith.constant 0 : index
      %55 = vector.load %arg5[%c0_34, %c0_35] : memref<1x4xf32, #tpu.memory_space<vmem>>, vector<1x4xf32>
      %56 = vector.broadcast %55 : vector<1x4xf32> to vector<16x4xf32>
      %57 = arith.addf %54, %56 : vector<16x4xf32>
      %58 = tpu.iota {dimensions = array<i32: 1>} : vector<16x4xi32>
      %false = arith.constant false
      %59 = vector.broadcast %false : i1 to vector<16x4xi1>
      %cst_36 = arith.constant dense<0xFF800000> : vector<16xf32>
      %60 = vector.multi_reduction <maximumf>, %57, %cst_36 [1] : vector<16x4xf32> to vector<16xf32>
      %61 = vector.shape_cast %60 : vector<16xf32> to vector<16x1xf32>
      %62 = vector.broadcast %61 : vector<16x1xf32> to vector<16x4xf32>
      %63 = arith.cmpf oeq, %57, %62 : vector<16x4xf32>
      %c4_i32 = arith.constant 4 : i32
      %64 = vector.broadcast %c4_i32 : i32 to vector<16x4xi32>
      %65 = arith.select %63, %58, %64 : vector<16x4xi1>, vector<16x4xi32>
      %cst_37 = arith.constant dense<2147483647> : vector<16xi32>
      %66 = vector.multi_reduction <minsi>, %65, %cst_37 [1] : vector<16x4xi32> to vector<16xi32>
      %67 = vector.shape_cast %66 : vector<16xi32> to vector<16x1xi32>
      %68 = vector.broadcast %67 : vector<16x1xi32> to vector<16x4xi32>
      %69 = arith.cmpi eq, %58, %68 : vector<16x4xi32>
      %70 = arith.ori %59, %69 : vector<16x4xi1>
      %cst_38 = arith.constant 0xFF800000 : f32
      %71 = vector.broadcast %cst_38 : f32 to vector<16x4xf32>
      %72 = arith.select %69, %71, %57 : vector<16x4xi1>, vector<16x4xf32>
      %cst_39 = arith.constant dense<0xFF800000> : vector<16xf32>
      %73 = vector.multi_reduction <maximumf>, %72, %cst_39 [1] : vector<16x4xf32> to vector<16xf32>
      %74 = vector.shape_cast %73 : vector<16xf32> to vector<16x1xf32>
      %75 = vector.broadcast %74 : vector<16x1xf32> to vector<16x4xf32>
      %76 = arith.cmpf oeq, %72, %75 : vector<16x4xf32>
      %c4_i32_40 = arith.constant 4 : i32
      %77 = vector.broadcast %c4_i32_40 : i32 to vector<16x4xi32>
      %78 = arith.select %76, %58, %77 : vector<16x4xi1>, vector<16x4xi32>
      %cst_41 = arith.constant dense<2147483647> : vector<16xi32>
      %79 = vector.multi_reduction <minsi>, %78, %cst_41 [1] : vector<16x4xi32> to vector<16xi32>
      %80 = vector.shape_cast %79 : vector<16xi32> to vector<16x1xi32>
      %81 = vector.broadcast %80 : vector<16x1xi32> to vector<16x4xi32>
      %82 = arith.cmpi eq, %58, %81 : vector<16x4xi32>
      %83 = arith.ori %70, %82 : vector<16x4xi1>
      %cst_42 = arith.constant 0xFF800000 : f32
      %84 = vector.broadcast %cst_42 : f32 to vector<16x4xf32>
      %85 = arith.select %83, %57, %84 : vector<16x4xi1>, vector<16x4xf32>
      %cst_43 = arith.constant dense<0xFF800000> : vector<16xf32>
      %86 = vector.multi_reduction <maximumf>, %85, %cst_43 [1] : vector<16x4xf32> to vector<16xf32>
      %87 = vector.shape_cast %86 : vector<16xf32> to vector<16x1xf32>
      %88 = vector.broadcast %87 : vector<16x1xf32> to vector<16x4xf32>
      %89 = arith.subf %57, %88 : vector<16x4xf32>
      %90 = math.exp %89 : vector<16x4xf32>
      %cst_44 = arith.constant 0.000000e+00 : f32
      %91 = vector.broadcast %cst_44 : f32 to vector<16x4xf32>
      %92 = arith.select %83, %90, %91 : vector<16x4xi1>, vector<16x4xf32>
      %cst_45 = arith.constant dense<0.000000e+00> : vector<16xf32>
      %93 = vector.multi_reduction <add>, %92, %cst_45 [1] : vector<16x4xf32> to vector<16xf32>
      %94 = vector.shape_cast %93 : vector<16xf32> to vector<16x1xf32>
      %95 = vector.broadcast %94 : vector<16x1xf32> to vector<16x4xf32>
      %96 = arith.divf %92, %95 : vector<16x4xf32>
      %c0_46 = arith.constant 0 : index
      %c0_47 = arith.constant 0 : index
      %97 = vector.load %arg11[%c0_46, %c0_47] : memref<16x4xf32, #tpu.memory_space<vmem>>, vector<16x4xf32>
      tpu.vector_store %arg11[%c0_46, %c0_47], %96 {strides = array<i32>} : memref<16x4xf32, #tpu.memory_space<vmem>>, vector<16x4xf32>,
    } else {
    }
    %c0 = arith.constant 0 : index
    %c0_2 = arith.constant 0 : index
    %5 = vector.load %arg11[%c0, %c0_2] : memref<16x4xf32, #tpu.memory_space<vmem>>, vector<16x4xf32>
    %6 = tpu.iota {dimensions = array<i32: 1>} : vector<16x4xi32>
    %7 = vector.broadcast %arg1 : i32 to vector<16x4xi32>
    %8 = arith.cmpi eq, %6, %7 : vector<16x4xi32>
    %cst = arith.constant 0.000000e+00 : f32
    %9 = vector.broadcast %cst : f32 to vector<16x4xf32>
    %10 = arith.select %8, %5, %9 : vector<16x4xi1>, vector<16x4xf32>
    %cst_3 = arith.constant dense<0.000000e+00> : vector<16xf32>
    %11 = vector.multi_reduction <add>, %10, %cst_3 [1] : vector<16x4xf32> to vector<16xf32>
    %12 = vector.shape_cast %11 : vector<16xf32> to vector<16x1xf32>
    %c0_4 = arith.constant 0 : index
    %c0_5 = arith.constant 0 : index
    %13 = vector.load %arg3[%c0_4, %c0_5] : memref<16x128xbf16, #tpu.memory_space<vmem>>, vector<16x128xbf16>
    %c0_6 = arith.constant 0 : index
    %c0_7 = arith.constant 0 : index
    %c0_8 = arith.constant 0 : index
    %14 = vector.load %arg6[%c0_6, %c0_7, %c0_8] : memref<1x128x128xbf16, #tpu.memory_space<vmem>>, vector<1x128x128xbf16>
    %15 = vector.shape_cast %14 : vector<1x128x128xbf16> to vector<128x128xbf16>
    %cst_9 = arith.constant dense<0.000000e+00> : vector<16x128xf32>
    %16 = tpu.matmul %13, %15, %cst_9 {dimension_numbers = #tpu.dot_dimension_numbers<[1], [0], [0], [1], [0, 0, 1, 1], [], []>} : vector<16x128xbf16>, vector<128x128xbf16>, vector<16x128xf32> -> vector<16x128xf32>
    %c1_i32 = arith.constant 1 : i32
    %17 = arith.muli %arg1, %c1_i32 : i32
    %18 = arith.addi %17, %arg2 : i32
    %19 = arith.index_cast %18 : i32 to index
    %c0_10 = arith.constant 0 : index
    %c0_11 = arith.constant 0 : index
    %20 = vector.load %arg7[%19, %c0_10, %c0_11] : memref<4x1x128xf32, #tpu.memory_space<vmem>>, vector<1x1x128xf32>
    %21 = vector.shape_cast %20 : vector<1x1x128xf32> to vector<1x128xf32>
    %22 = vector.broadcast %21 : vector<1x128xf32> to vector<16x128xf32>
    %23 = arith.addf %16, %22 : vector<16x128xf32>
    %24 = arith.mulf %23, %23 : vector<16x128xf32>
    %25 = arith.mulf %23, %24 : vector<16x128xf32>
    %cst_12 = arith.constant 4.471500e-02 : f32
    %26 = vector.broadcast %cst_12 : f32 to vector<16x128xf32>
    %27 = arith.mulf %26, %25 : vector<16x128xf32>
    %28 = arith.addf %23, %27 : vector<16x128xf32>
    %cst_13 = arith.constant 0.797884583 : f32
    %29 = vector.broadcast %cst_13 : f32 to vector<16x128xf32>
    %30 = arith.mulf %29, %28 : vector<16x128xf32>
    %31 = math.tanh %30 : vector<16x128xf32>
    %cst_14 = arith.constant 1.000000e+00 : f32
    %32 = vector.broadcast %cst_14 : f32 to vector<16x128xf32>
    %33 = arith.addf %32, %31 : vector<16x128xf32>
    %cst_15 = arith.constant 5.000000e-01 : f32
    %34 = vector.broadcast %cst_15 : f32 to vector<16x128xf32>
    %35 = arith.mulf %34, %33 : vector<16x128xf32>
    %36 = arith.mulf %23, %35 : vector<16x128xf32>
    %37 = arith.truncf %36 : vector<16x128xf32> to vector<16x128xbf16>
    %c0_16 = arith.constant 0 : index
    %c0_17 = arith.constant 0 : index
    %c0_18 = arith.constant 0 : index
    %38 = vector.load %arg8[%c0_16, %c0_17, %c0_18] : memref<1x128x128xbf16, #tpu.memory_space<vmem>>, vector<1x128x128xbf16>
    %39 = vector.shape_cast %38 : vector<1x128x128xbf16> to vector<128x128xbf16>
    %cst_19 = arith.constant dense<0.000000e+00> : vector<16x128xf32>
    %40 = tpu.matmul %37, %39, %cst_19 {dimension_numbers = #tpu.dot_dimension_numbers<[1], [0], [0], [1], [0, 0, 1, 1], [], []>} : vector<16x128xbf16>, vector<128x128xbf16>, vector<16x128xf32> -> vector<16x128xf32>
    %c0_i32_20 = arith.constant 0 : i32
    %41 = arith.cmpi eq, %arg2, %c0_i32_20 : i32
    %42 = arith.extui %41 : i1 to i32
    %c0_i32_21 = arith.constant 0 : i32
    %43 = arith.cmpi ne, %42, %c0_i32_21 : i32
    scf.if %43 {
      %c0_26 = arith.constant 0 : index
      %c0_27 = arith.constant 0 : index
      %49 = vector.load %arg10[%c0_26, %c0_27] : memref<16x128xf32, #tpu.memory_space<vmem>>, vector<16x128xf32>
      %50 = arith.index_cast %arg1 : i32 to index
      %c0_28 = arith.constant 0 : index
      %c0_29 = arith.constant 0 : index
      %51 = vector.load %arg9[%50, %c0_28, %c0_29] : memref<4x1x128xf32, #tpu.memory_space<vmem>>, vector<1x1x128xf32>
      %52 = vector.shape_cast %51 : vector<1x1x128xf32> to vector<1x128xf32>
      %53 = vector.broadcast %12 : vector<16x1xf32> to vector<16x128xf32>
      %54 = vector.broadcast %52 : vector<1x128xf32> to vector<16x128xf32>
      %55 = arith.mulf %53, %54 : vector<16x128xf32>
      %56 = arith.addf %49, %55 : vector<16x128xf32>
      %c0_30 = arith.constant 0 : index
      %c0_31 = arith.constant 0 : index
      %57 = vector.load %arg10[%c0_30, %c0_31] : memref<16x128xf32, #tpu.memory_space<vmem>>, vector<16x128xf32>
      tpu.vector_store %arg10[%c0_30, %c0_31], %56 {strides = array<i32>} : memref<16x128xf32, #tpu.memory_space<vmem>>, vector<16x128xf32>,
    } else {
    }
    %c0_22 = arith.constant 0 : index
    %c0_23 = arith.constant 0 : index
    %44 = vector.load %arg10[%c0_22, %c0_23] : memref<16x128xf32, #tpu.memory_space<vmem>>, vector<16x128xf32>
    %45 = vector.broadcast %12 : vector<16x1xf32> to vector<16x128xf32>
    %46 = arith.mulf %45, %40 : vector<16x128xf32>
    %47 = arith.addf %44, %46 : vector<16x128xf32>
    %c0_24 = arith.constant 0 : index
    %c0_25 = arith.constant 0 : index
    %48 = vector.load %arg10[%c0_24, %c0_25] : memref<16x128xf32, #tpu.memory_space<vmem>>, vector<16x128xf32>
    tpu.vector_store %arg10[%c0_24, %c0_25], %47 {strides = array<i32>} : memref<16x128xf32, #tpu.memory_space<vmem>>, vector<16x128xf32>,
    return
  }
  func.func @transform_0(%arg0: i32, %arg1: i32, %arg2: i32) -> (i32, i32) {
    %c0_i32 = arith.constant 0 : i32
    %c0_i32_0 = arith.constant 0 : i32
    return %arg0, %c0_i32 : i32, i32
  }
  func.func @transform_1(%arg0: i32, %arg1: i32, %arg2: i32) -> (i32, i32) {
    %c0_i32 = arith.constant 0 : i32
    %c0_i32_0 = arith.constant 0 : i32
    %c0_i32_1 = arith.constant 0 : i32
    return %c0_i32, %c0_i32_0 : i32, i32
  }
  func.func @transform_2(%arg0: i32, %arg1: i32, %arg2: i32) -> (i32, i32) {
    %c0_i32 = arith.constant 0 : i32
    %c0_i32_0 = arith.constant 0 : i32
    %c0_i32_1 = arith.constant 0 : i32
    return %c0_i32, %c0_i32_0 : i32, i32
  }
  func.func @transform_3(%arg0: i32, %arg1: i32, %arg2: i32) -> (i32, i32, i32) {
    %c0_i32 = arith.constant 0 : i32
    %c0_i32_0 = arith.constant 0 : i32
    return %arg1, %c0_i32, %arg2 : i32, i32, i32
  }
  func.func @transform_4(%arg0: i32, %arg1: i32, %arg2: i32) -> (i32, i32, i32) {
    %c0_i32 = arith.constant 0 : i32
    %c0_i32_0 = arith.constant 0 : i32
    %c0_i32_1 = arith.constant 0 : i32
    %c0_i32_2 = arith.constant 0 : i32
    return %c0_i32, %c0_i32_0, %c0_i32_1 : i32, i32, i32
  }
  func.func @transform_5(%arg0: i32, %arg1: i32, %arg2: i32) -> (i32, i32, i32) {
    %c0_i32 = arith.constant 0 : i32
    %c0_i32_0 = arith.constant 0 : i32
    return %arg1, %arg2, %c0_i32 : i32, i32, i32
  }
  func.func @transform_6(%arg0: i32, %arg1: i32, %arg2: i32) -> (i32, i32, i32) {
    %c0_i32 = arith.constant 0 : i32
    %c0_i32_0 = arith.constant 0 : i32
    %c0_i32_1 = arith.constant 0 : i32
    %c0_i32_2 = arith.constant 0 : i32
    return %c0_i32, %c0_i32_0, %c0_i32_1 : i32, i32, i32
  }
  func.func @transform_7(%arg0: i32, %arg1: i32, %arg2: i32) -> (i32, i32) {
    %c0_i32 = arith.constant 0 : i32
    %c0_i32_0 = arith.constant 0 : i32
    return %arg0, %c0_i32 : i32, i32
  }
}

</mosaic_0001>

<bundles_post_ra>
// kernel: tpu_custom_call.1
= control target key start
LH: loop header
LB: loop body
LE: loop exit
PB: predicated region body
PF: predicated region fallthrough
CT: control target
= control target key end

     0   :  { %s1758_s0 = inlined_call_operand.vmem [shape: bf16[16,128], index: 0, kind: input, shape index: {}]   ;;  %s1759_s1 = inlined_call_operand.vmem [shape: f32[128,4], index: 1, kind: input, shape index: {}]   ;;  %s1760_s2 = inlined_call_operand.vmem [shape: f32[1,4], index: 2, kind: input, shape index: {}]   ;;  %s1761_s3 = inlined_call_operand.hbm [shape: bf16[4,128,128], index: 3, kind: input, shape index: {}]   ;;  %s1762_s4 = inlined_call_operand.vmem [shape: f32[4,1,128], index: 4, kind: input, shape index: {}]   ;;  %s1763_s5 = inlined_call_operand.hbm [shape: bf16[4,128,128], index: 5, kind: input, shape index: {}]   ;;  %s1764_s6 = inlined_call_operand.vmem [shape: f32[4,1,128], index: 6, kind: input, shape index: {}]   ;;  %s1765_s7 = inlined_call_operand.hbm [shape: f32[16,128], index: 7, kind: output, shape index: {}]  }
   0x1   :  { %1768 = sst [smem:[#allocation13_spill]] %s1761_s3 }
   0x2   :  { %12 = vsyncpa [#allocation4], 0 }
   0x3   :  { %14 = vsyncpa [#allocation4 + $0x1], 0 }
   0x4   :  { %15 = vsyncpa [#allocation7], 0 }
   0x5   :  { %17 = vsyncpa [#allocation7 + $0x1], 0 }
   0x6   :  { %18 = vsyncpa [#allocation5], 0  ;;  %s1469_s24 = smov 0   ;;  %s1471_s25 = smov 0  }
   0x7   :  { %s1473_s26 = smov 0   ;;  %s1475_s27 = smov 0  }
   0x8   :  { %s1477_s28 = smov 0   ;;  %s1479_s29 = smov 0  }
   0x9 LB: > { %s1766_s30 = sadd.s32 4294967295, %s1417_s29   ;;  %s39_s8 = sadd.s32 1, %s1413_s28  ;;  %s1417_s29 = sphi %s1479_s29, %s24_s29   ;;  %s1413_s28 = sphi %s1477_s28, %s1786_s28   ;;  %s1409_s27 = sphi %s1475_s27, %s1785_s27   ;;  %s1405_s26 = sphi %s1473_s26, %s1784_s26   ;;  %s1401_s25 = sphi %s1471_s25, %s1783_s25   ;;  %s1397_s24 = sphi %s1469_s24, %s1782_s24  }
   0xa   : > { %p41_p0 = scmp.ge.s32.totalorder %s39_s8, 4  ;;  %s120_s9 = sadd.s32 1, %s1405_s26 }
   0xb   : > { %p127_p1 = scmp.ne.s32.totalorder %s1405_s26, %s1401_s25  ;;  %p128_p2 = scmp.eq.s32.totalorder %s1417_s29, 0 }
   0xc   : > { %s1788_s8 = smov (%p41_p0, %s39_s8), 0  ;;  %p133_p4 = scmp.ne.s32.totalorder %s1401_s25, %s1397_s24 }
   0xd   : > { %1769 = sst [smem:[#allocation12_spill]] %s1788_s8  ;;  %p1505_p3 = por %p128_p2, %p127_p1 }
   0xe   : > { %s115_s11 = ssub.s32 %s1413_s28, %s1788_s8  ;;  %p134_p5 = scmp.eq.s32.totalorder %s1766_s30, 0 }
   0xf   : > { %p118_p6 = scmp.eq.s32.totalorder %s115_s11, 0  ;;  %p1191_p8 = scmp.lt.s32.totalorder %s1417_s29, 4 }
  0x10   : > { %p1514_p7 = por %p134_p5, %p133_p4  ;;  %s1523_s14 = sand.u32 1, %s1405_s26  }
  0x11   : > { %s1520_s13 = scalar_select %p118_p6, %s1405_s26, %s120_s9  }
  0x12   : > { %s1058_s15 = sshll.u32 %s1413_s28, 10  ;;  %s1024_s16 = sshll.u32 %s1523_s14, 6 }
  0x13   : > { %s1772_s3 = sld [smem:[#allocation13_spill]]  ;;  %s278_s20 = scalar_lea.vmem [#allocation3], %s1024_s16 }
  0x14   : > { %s286_s21 = sshll.u32 %s278_s20, 4  ;;  %p1534_p9 = pnand %p1191_p8, %p1505_p3  ;;  %s287_s21 = int_to_ptr.vmem [resolvable:$true] %s286_s21 }
  0x15   : > { %s275_s23 = scalar_lea.sflag [#allocation4], %s1523_s14  ;;  %s1292_s24 = scalar_lea.vmem %s287_s21, 1024 }
  0x16   : > { %p1281_p10 = pneg %p1534_p9  ;;  %p1293_p11 = scmp.ne.s32.totalorder %s287_s21, %s1292_s24 }
  0x17   : > { %s1419_s9 = smov [#allocation3]  }
  0x18   : > { %p1295_p12 = pnand %p1293_p11, %p1281_p10  ;;  %s1297_s11 = sshll.u32 %s1419_s9, 4  ;;  %s1298_s11 = int_to_ptr.vmem [resolvable:$false] %s1297_s11 }
  0x19   : > { %s285_s19 = scalar_lea.hbm %s1772_s3, %s1058_s15  ;;  %s1299_s10 = scalar_lea.vmem %s1298_s11, 2048 }
  0x1a   : > { %p1296_p13 = pneg %p1295_p12  ;;  %p1300_p0 = scmp.lt.s32.totalorder %s287_s21, %s1298_s11 }
  0x1b   : > { %p1301_p1 = scmp.lt.s32.totalorder %s1299_s10, %s1292_s24 }
  0x1d   : > { %p1302_p2 = por %p1301_p1, %p1300_p0 }
  0x1f   : > { %p1303_p3 = pnand %p1302_p2, %p1296_p13 }
  0x21   : > { %1306 = shalt.err (!%p1303_p3)
}
  0x22   : > { %s1420_s17 = smov 64   ;;  %s1421_s18 = smov 4  }
  0x23   : > { %1187 = dma.hbm_to_vmem [thread:$0]  (!%p1534_p9), %s285_s19, 1024, %s287_s21, %s275_s23, %s1420_s17, %s1420_s17, %s1421_s18  }
  0x24   : > { %p1030_p4 = scmp.ge.s32.totalorder %s1417_s29, 1  ;;  %p317_p5 = scmp.lt.s32.totalorder %s1417_s29, 5 }
  0x25   : > { %s308_s11 = scalar_lea.hbm %s1763_s5, %s1058_s15  ;;  %s300_s10 = scalar_lea.vmem [#allocation6], %s1024_s16 }
  0x26   : > { %p1548_p6 = pnand %p1030_p4, %p317_p5  ;;  %s309_s30 = sshll.u32 %s300_s10, 4  ;;  %s310_s30 = int_to_ptr.vmem [resolvable:$true] %s309_s30 }
  0x27   : > { %s297_s3 = scalar_lea.sflag [#allocation7], %s1523_s14  ;;  %s1320_s8 = scalar_lea.vmem %s310_s30, 1024 }
  0x28   : > { %p1321_p8 = scmp.ne.s32.totalorder %s310_s30, %s1320_s8  ;;  %s1422_s19 = smov [#allocation6]  }
  0x29   : > { %s1325_s21 = sshll.u32 %s1422_s19, 4  ;;  %s1326_s21 = int_to_ptr.vmem [resolvable:$false] %s1325_s21 }
  0x2a   : > { %p1323_p11 = pnand %p1321_p8, %p1281_p10  ;;  %s1327_s23 = scalar_lea.vmem %s1326_s21, 2048 }
  0x2b   : > { %p1328_p13 = scmp.lt.s32.totalorder %s310_s30, %s1326_s21  ;;  %p1329_p0 = scmp.lt.s32.totalorder %s1327_s23, %s1320_s8 }
  0x2c   : > { %p1324_p12 = pneg %p1323_p11 }
  0x2d   : > { %p1330_p1 = por %p1329_p0, %p1328_p13 }
  0x2f   : > { %p1331_p2 = pnand %p1330_p1, %p1324_p12 }
  0x31   : > { %1334 = shalt.err (!%p1331_p2)
}
  0x32   : > { %1190 = dma.hbm_to_vmem [thread:$0]  (!%p1534_p9), %s308_s11, 1024, %s310_s30, %s297_s3, %s1420_s17, %s1420_s17, %s1421_s18  }
  0x33   : > { %321 = sbr.rel (%p1548_p6) target bundleno = 1940 (0x794), region = 48  ;;  %s323_s14 = sand.u32 (!%p1548_p6), 1, %s1401_s25  }
  0x34   : > { %s1031_s15 = sshll.u32 (!%p1548_p6), %s323_s14, 6  ;;  %s324_s16 = scalar_lea.sflag (!%p1548_p6), [#allocation4], %s323_s14 }
  0x35   : > { %s1566_s24 = scalar_lea.vmem (!%p1548_p6), [#allocation3], %s1031_s15 }
  0x38   : > { %1384 = dma.done.wait (%p1514_p7), %s324_s16, 1024  }
  0x39   : > { %1386 = vsyncadd (%p1514_p7), %s324_s16, 4294966272  ;;  %s333_s8 = scalar_lea.sflag [#allocation7], %s323_s14  ;;  %s1572_s9 = scalar_lea.vmem [#allocation6], %s1031_s15 }
  0x3a   : > { %1388 = dma.done.wait (%p1514_p7), %s333_s8, 1024  }
  0x3b   : > { %1390 = vsyncadd (%p1514_p7), %s333_s8, 4294966272  ;;  %p381_p9 = scmp.eq.s32.totalorder %s1409_s27, 0 }
  0x3c   : > { %v408_v0 = vld [vmem:[%s1759_s1 + $0x78] sm:$0xff] (%p381_p9)  ;;  %v407_v1 = vld [vmem:[%s1759_s1 + $0x70] sm:$0xff] (%p381_p9)  ;;  %v1423_v2 = vmov (%p381_p9), 0.0   ;;  %v406_v3 = vld [vmem:[%s1759_s1 + $0x68] sm:$0xff] (%p381_p9)  ;;  %vm493_vm0 = vcmask (%p381_p9), 31744   ;;  %v491_v27 = vlaneseq (%p381_p9) }
  0x3d   : > { %386 = sbr.rel (!%p381_p9) target bundleno = 1469 (0x5bd), region = 60  ;;  %387 = vst [vmem:[#allocation8] sm:$0xff] (%p381_p9), %v1423_v2  ;;  %388 = vst [vmem:[#allocation8 + $0x8] sm:$0xff] (%p381_p9), %v1423_v2  ;;  %1101 = vmatprep.subr.mxu0 (%p381_p9), %v408_v0  ;;  %v405_v4 = vld [vmem:[%s1759_s1 + $0x60] sm:$0xff] (%p381_p9)  ;;  %v404_v6 = vld [vmem:[%s1759_s1 + $0x58] sm:$0xff] (%p381_p9) }
  0x3e   : > { %1102 = vmatpush3.msra.mxu0 (%p381_p9), %v408_v0  ;;  %v1062_v5 = vld [vmem:[%s1758_s0] sm:$0xff] (%p381_p9)   ;;  %v403_v8 = vld [vmem:[%s1759_s1 + $0x50] sm:$0xff] (%p381_p9)  ;;  %v402_v9 = vld [vmem:[%s1759_s1 + $0x48] sm:$0xff] (%p381_p9)  ;;  %v1641_v28 = vand.u32 (%p381_p9), 127, %v491_v27 }
  0x3f   : > { %1103 = vmatprep.subr.mxu0 (%p381_p9), %v407_v1  ;;  %v1063_v7 = vunpack.c.l.bf16 (%p381_p9), %v1062_v5  ;;  %v401_v10 = vld [vmem:[%s1759_s1 + $0x40] sm:$0xff] (%p381_p9)  ;;  %v400_v11 = vld [vmem:[%s1759_s1 + $0x38] sm:$0xff] (%p381_p9)  ;;  %v399_v12 = vld [vmem:[%s1759_s1 + $0x30] sm:$0xff] (%p381_p9)  ;;  %v1064_v19 = vunpack.c.h.bf16 (%p381_p9), %v1062_v5 }
  0x40   : > { %1104 = vmatpush3.msra.mxu0 (%p381_p9), %v407_v1  ;;  %v398_v13 = vld [vmem:[%s1759_s1 + $0x28] sm:$0xff] (%p381_p9)  ;;  %v397_v14 = vld [vmem:[%s1759_s1 + $0x20] sm:$0xff] (%p381_p9)  ;;  %v396_v15 = vld [vmem:[%s1759_s1 + $0x18] sm:$0xff] (%p381_p9) }
  0x41   : > { %1105 = vmatprep.subr.mxu0 (%p381_p9), %v406_v3  ;;  %1133 = vmatprep.mubr.f32.mxu0 (%p381_p9), %v1063_v7  ;;  %v395_v16 = vld [vmem:[%s1759_s1 + $0x10] sm:$0xff] (%p381_p9)  ;;  %v394_v17 = vld [vmem:[%s1759_s1 + $0x8] sm:$0xff] (%p381_p9)  ;;  %v393_v18 = vld [vmem:[%s1759_s1] sm:$0xff] (%p381_p9) }
  0x42   : > { %1106 = vmatpush3.msra.mxu0 %v406_v3  ;;  %v1034_v21 = vld [vmem:[%s1760_s2] ss:$0 sm:$0xff] }
  0x43   : > { %1107 = vmatprep.subr.mxu0 %v405_v4 }
  0x44   : > { %1108 = vmatpush3.msra.mxu0 %v405_v4 }
  0x45   : > { %1109 = vmatprep.subr.mxu0 %v404_v6 }
  0x46   : > { %1110 = vmatpush3.msra.mxu0 %v404_v6 }
  0x47   : > { %1111 = vmatprep.subr.mxu0 %v403_v8 }
  0x48   : > { %1112 = vmatpush3.msra.mxu0 %v403_v8 }
  0x49   : > { %1113 = vmatprep.subr.mxu0 %v402_v9 }
  0x4a   : > { %1114 = vmatpush3.msra.mxu0 %v402_v9 }
  0x4b   : > { %1115 = vmatprep.subr.mxu0 %v401_v10 }
  0x4c   : > { %1116 = vmatpush3.msra.mxu0 %v401_v10 }
  0x4d   : > { %1117 = vmatprep.subr.mxu0 %v400_v11 }
  0x4e   : > { %1118 = vmatpush3.msra.mxu0 %v400_v11 }
  0x4f   : > { %1119 = vmatprep.subr.mxu0 %v399_v12 }
  0x50   : > { %1120 = vmatpush3.msra.mxu0 %v399_v12 }
  0x51   : > { %1121 = vmatprep.subr.mxu0 %v398_v13 }
  0x52   : > { %1122 = vmatpush3.msra.mxu0 %v398_v13 }
  0x53   : > { %1123 = vmatprep.subr.mxu0 %v397_v14 }
  0x54   : > { %1124 = vmatpush3.msra.mxu0 %v397_v14 }
  0x55   : > { %1125 = vmatprep.subr.mxu0 %v396_v15 }
  0x56   : > { %1126 = vmatpush3.msra.mxu0 %v396_v15 }
  0x57   : > { %1127 = vmatprep.subr.mxu0 %v395_v16 }
  0x58   : > { %1128 = vmatpush3.msra.mxu0 %v395_v16 }
  0x59   : > { %1129 = vmatprep.subr.mxu0 %v394_v17 }
  0x5a   : > { %1130 = vmatpush3.msra.mxu0 %v394_v17 }
  0x5b   : > { %1131 = vmatprep.subr.mxu0 %v393_v18 }
  0x5c   : > { %1132 = vmatpush3.msra.mxu0 %v393_v18 }
  0x5d   : > { %1134 = vmatmul.mubr.f32.vlgmr.msra.gmra.mxu0 %v1064_v19 }
 0x11d   : > { %v1135_v20 = vpop.f32.mrf.mxu0 }
 0x11e   : > { %v1635_v24 = vadd.f32 %v1135_v20, %v1034_v21 }
 0x11f   : > { %v482_v22 = vpop.f32.mrf.mxu0 }
 0x120   : > { %v1633_v23 = vadd.f32 %v1034_v21, %v482_v22  ;;  %v497_v26 = vsel %vm493_vm0, %v1635_v24, -inf }
 0x122   : > { %v494_v25 = vsel %vm493_vm0, %v1633_v23, -inf }
 0x123   : > { %495 = vmax.xlane.f32.xlu0 %v494_v25 }
 0x127   : > { %498 = vmax.xlane.f32.xlu0 %v497_v26 }
 0x1ac   : > { %v496_v29 = vpop.xlane.xlu0 %495 }
 0x1ad   : > { %vm500_vm1 = vcmp.eq.f32.partialorder %v1633_v23, %v496_v29 }
 0x1ae   : > { %v502_v30 = vsel %vm500_vm1, %v1641_v28, 4 }
 0x1af   : > { %v504_v31 = vsel %vm493_vm0, %v502_v30, 2147483647 }
 0x1b0   : > { %v499_v32 = vpop.xlane.xlu0 %498  ;;  %v506_v33 = vshra.s32 %v504_v31, 16  ;;  %v505_v39 = vand.u32 65535, %v504_v31 }
 0x1b1   : > { %vm501_vm2 = vcmp.eq.f32.partialorder %v1635_v24, %v499_v32 }
 0x1b2   : > { %v503_v34 = vsel %vm501_vm2, %v1641_v28, 4  ;;  %v508_v35 = vcvt.s32.f32 %v506_v33  ;;  %v507_v41 = vcvt.s32.f32 %v505_v39 }
 0x1b3   : > { %v519_v36 = vsel %vm493_vm0, %v503_v34, 2147483647 }
 0x1b4   : > { %509 = vmin.xlane.f32.xlu1 %v508_v35  ;;  %v521_v37 = vshra.s32 %v519_v36, 16  ;;  %v520_v42 = vand.u32 65535, %v519_v36 }
 0x1b6   : > { %v523_v38 = vcvt.s32.f32 %v521_v37  ;;  %v522_v45 = vcvt.s32.f32 %v520_v42 }
 0x1b8   : > { %524 = vmin.xlane.f32.xlu1 %v523_v38 }
 0x23d   : > { %v510_v40 = vpop.xlane.xlu1 %509 }
 0x23e   : > { %vm511_vm3 = vcmp.eq.f32.partialorder %v508_v35, %v510_v40  ;;  %v516_v47 = vcvt.f32.s32 %v510_v40 }
 0x23f   : > { %v512_v43 = vsel %vm511_vm3, %v507_v41, inf }
 0x240   : > { %513 = vmin.xlane.f32.xlu0 %v512_v43  ;;  %v517_v49 = vshll.u32 %v516_v47, 16 }
 0x241   : > { %v525_v44 = vpop.xlane.xlu1 %524 }
 0x242   : > { %vm526_vm4 = vcmp.eq.f32.partialorder %v523_v38, %v525_v44  ;;  %v531_v50 = vcvt.f32.s32 %v525_v44 }
 0x243   : > { %v527_v46 = vsel %vm526_vm4, %v522_v45, inf }
 0x244   : > { %528 = vmin.xlane.f32.xlu1 %v527_v46  ;;  %v532_v54 = vshll.u32 %v531_v50, 16 }
 0x2c9   : > { %v514_v48 = vpop.xlane.xlu0 %513 }
 0x2ca   : > { %v515_v51 = vcvt.f32.s32 %v514_v48 }
 0x2cc   : > { %v518_v52 = vadd.s32 %v517_v49, %v515_v51 }
 0x2cd   : > { %v529_v53 = vpop.xlane.xlu1 %528 }
 0x2ce   : > { %v530_v55 = vcvt.f32.s32 %v529_v53  ;;  %vm534_vm5 = vcmp.eq.s32.totalorder %v1641_v28, %v518_v52 }
 0x2cf   : > { %v536_v56 = vsel %vm534_vm5, -inf, %v1633_v23 }
 0x2d0   : > { %v533_v57 = vadd.s32 %v532_v54, %v530_v55  ;;  %v538_v58 = vsel %vm493_vm0, %v536_v56, -inf }
 0x2d1   : > { %539 = vmax.xlane.f32.xlu0 %v538_v58 }
 0x2d2   : > { %vm535_vm6 = vcmp.eq.s32.totalorder %v1641_v28, %v533_v57 }
 0x2d3   : > { %v537_v59 = vsel %vm535_vm6, -inf, %v1635_v24 }
 0x2d4   : > { %v541_v60 = vsel %vm493_vm0, %v537_v59, -inf }
 0x2d5   : > { %542 = vmax.xlane.f32.xlu1 %v541_v60 }
 0x35a   : > { %v540_v61 = vpop.xlane.xlu0 %539 }
 0x35b   : > { %vm544_vm7 = vcmp.eq.f32.partialorder %v536_v56, %v540_v61 }
 0x35c   : > { %v546_v62 = vsel %vm544_vm7, %v1641_v28, 4 }
 0x35d   : > { %v548_v63 = vsel %vm493_vm0, %v546_v62, 2147483647 }
 0x35e   : > { %v543_v0 = vpop.xlane.xlu1 %542  ;;  %v550_v1 = vshra.s32 %v548_v63, 16  ;;  %v549_v7 = vand.u32 65535, %v548_v63 }
 0x35f   : > { %vm545_vm8 = vcmp.eq.f32.partialorder %v537_v59, %v543_v0 }
 0x360   : > { %v547_v2 = vsel %vm545_vm8, %v1641_v28, 4  ;;  %v552_v3 = vcvt.s32.f32 %v550_v1  ;;  %v551_v9 = vcvt.s32.f32 %v549_v7 }
 0x361   : > { %v563_v4 = vsel %vm493_vm0, %v547_v2, 2147483647 }
 0x362   : > { %553 = vmin.xlane.f32.xlu0 %v552_v3  ;;  %v565_v5 = vshra.s32 %v563_v4, 16  ;;  %v564_v10 = vand.u32 65535, %v563_v4 }
 0x364   : > { %v567_v6 = vcvt.s32.f32 %v565_v5  ;;  %v566_v13 = vcvt.s32.f32 %v564_v10 }
 0x366   : > { %568 = vmin.xlane.f32.xlu1 %v567_v6 }
 0x3eb   : > { %v554_v8 = vpop.xlane.xlu0 %553 }
 0x3ec   : > { %vm555_vm9 = vcmp.eq.f32.partialorder %v552_v3, %v554_v8  ;;  %v560_v15 = vcvt.f32.s32 %v554_v8 }
 0x3ed   : > { %v556_v11 = vsel %vm555_vm9, %v551_v9, inf }
 0x3ee   : > { %557 = vmin.xlane.f32.xlu0 %v556_v11  ;;  %v561_v17 = vshll.u32 %v560_v15, 16 }
 0x3ef   : > { %v569_v12 = vpop.xlane.xlu1 %568 }
 0x3f0   : > { %vm570_vm10 = vcmp.eq.f32.partialorder %v567_v6, %v569_v12  ;;  %v575_v18 = vcvt.f32.s32 %v569_v12 }
 0x3f1   : > { %v571_v14 = vsel %vm570_vm10, %v566_v13, inf }
 0x3f2   : > { %572 = vmin.xlane.f32.xlu1 %v571_v14  ;;  %v576_v22 = vshll.u32 %v575_v18, 16 }
 0x477   : > { %v558_v16 = vpop.xlane.xlu0 %557 }
 0x478   : > { %v559_v19 = vcvt.f32.s32 %v558_v16 }
 0x47a   : > { %v562_v20 = vadd.s32 %v561_v17, %v559_v19 }
 0x47b   : > { %v573_v21 = vpop.xlane.xlu1 %572 }
 0x47c   : > { %v574_v25 = vcvt.f32.s32 %v573_v21  ;;  %vm578_vm11 = vcmp.eq.s32.totalorder %v1641_v28, %v562_v20 }
 0x47d   : > { %vm1666_vm12 = vmor %vm534_vm5, %vm578_vm11 }
 0x47e   : > { %v577_v27 = vadd.s32 %v576_v22, %v574_v25  ;;  %v582_v29 = vsel %vm1666_vm12, %v1633_v23, -inf }
 0x47f   : > { %v584_v30 = vsel %vm493_vm0, %v582_v29, -inf }
 0x480   : > { %585 = vmax.xlane.f32.xlu0 %v584_v30  ;;  %vm579_vm13 = vcmp.eq.s32.totalorder %v1641_v28, %v577_v27 }
 0x481   : > { %vm1677_vm14 = vmor %vm535_vm6, %vm579_vm13 }
 0x482   : > { %v583_v32 = vsel %vm1677_vm14, %v1635_v24, -inf }
 0x483   : > { %v587_v33 = vsel %vm493_vm0, %v583_v32, -inf }
 0x484   : > { %588 = vmax.xlane.f32.xlu1 %v587_v33 }
 0x509   : > { %v586_v34 = vpop.xlane.xlu0 %585 }
 0x50a   : > { %v590_v35 = vsub.f32 %v1633_v23, %v586_v34 }
 0x50c   : > { %v592_v36 = vmul.f32 1.442695, %v590_v35 }
 0x50d   : > { %v589_v37 = vpop.xlane.xlu1 %588 }
 0x50e   : > { %1250 = vpow2.f32 %v592_v36  ;;  %v591_v38 = vsub.f32 %v1635_v24, %v589_v37 }
 0x510   : > { %v594_v28 = vmul.f32 1.442695, %v591_v38 }
 0x512   : > { %1252 = vpow2.f32 %v594_v28 }
 0x51b   : > { %v1251_v39 = vpop.eup %1250 }
 0x51c   : > { %v596_v40 = vsel %vm1666_vm12, %v1251_v39, 0.0 }
 0x51d   : > { %v598_v41 = vsel %vm493_vm0, %v596_v40, 0.0 }
 0x51e   : > { %599 = vadd.xlane.f32.xlu0 %v598_v41 }
 0x51f   : > { %v1253_v42 = vpop.eup %1252 }
 0x520   : > { %v597_v43 = vsel %vm1677_vm14, %v1253_v42, 0.0 }
 0x521   : > { %v601_v23 = vsel %vm493_vm0, %v597_v43, 0.0 }
 0x522   : > { %602 = vadd.xlane.f32.xlu1 %v601_v23 }
 0x5a7   : > { %v600_v44 = vpop.xlane.xlu0 %599 }
 0x5a8   : > { %1254 = vrcp.f32 %v600_v44 }
 0x5ab   : > { %v603_v45 = vpop.xlane.xlu1 %602 }
 0x5ac   : > { %1256 = vrcp.f32 %v603_v45 }
 0x5b5   : > { %v1255_v24 = vpop.eup %1254 }
 0x5b6   : > { %v605_v46 = vmul.f32 %v1255_v24, %v596_v40 }
 0x5b8   : > { %608 = vst.msk [vmem:[#allocation2] sm:$0xff] %vm493_vm0, %v605_v46 }
 0x5b9   : > { %v1257_v47 = vpop.eup %1256 }
 0x5ba   : > { %v607_v48 = vmul.f32 %v1257_v47, %v597_v43 }
 0x5bc   : > { %609 = vst.msk [vmem:[#allocation2 + $0x8] sm:$0xff] %vm493_vm0, %v607_v48 }
 0x5bd PF: > { %v1258_v49 = vld [vmem:[%s1566_s24 + $0x38] sm:$0xff]   ;;  %v1424_v50 = vmov 0.0   ;;  %v1259_v51 = vld [vmem:[%s1566_s24 + $0x30] sm:$0xff]   ;;  %vm1425_vm15 = vmmov 0   ;;  %v1260_v52 = vld [vmem:[%s1566_s24 + $0x28] sm:$0xff]   ;;  %v612_v3 = vlaneseq  ;;  %v614_v4 = vstv %s1409_s27  ;;  %s876_s19 = scalar_lea.vmem %s1764_s6, %s1409_s27  ;;  %s1426_s21 = smov [#allocation8]  }
 0x5be   : > { %1136 = vmatprep.subr.bf16.mxu0 %v1424_v50  ;;  %1156 = vmatprep.subr.bf16.mxu1 %v1424_v50  ;;  %v1261_v53 = vld [vmem:[%s1566_s24 + $0x20] sm:$0xff]   ;;  %v1262_v54 = vld [vmem:[%s1566_s24 + $0x18] sm:$0xff]   ;;  %v1263_v55 = vld [vmem:[%s1566_s24 + $0x10] sm:$0xff]   ;;  %vm618_vm0 = vcmask 31744   ;;  %s907_s23 = sshll.u32 %s1426_s21, 4  ;;  %s908_s23 = int_to_ptr.vmem [resolvable:$true] %s907_s23 }
 0x5bf   : > { %1137 = vmatpush3.bf16.msra.mxu0 %v1258_v49  ;;  %1152 = vmatprep.mubr.msk.bf16.mxu0 %vm1425_vm15, %v1424_v50  ;;  %v1264_v56 = vld [vmem:[%s1566_s24 + $0x8] sm:$0xff]   ;;  %v1265_v57 = vld [vmem:[%s1566_s24] sm:$0xff]   ;;  %v1266_v58 = vld [vmem:[%s1758_s0] sm:$0xff]   ;;  %v613_v6 = vand.u32 127, %v612_v3  ;;  %s1335_s15 = scalar_lea.vmem %s908_s23, 256  ;;  %p1342_p5 = scmp.lt.s32.totalorder %s908_s23, %s908_s23 }
 0x5c0   : > { %1138 = vmatprep.subr.bf16.mxu0 %v1424_v50  ;;  %1172 = vmatprep.mubr.msk.bf16.mxu1 %vm1425_vm15, %v1424_v50  ;;  %v1267_v59 = vld [vmem:[%s1572_s9 + $0x38] sm:$0xff]   ;;  %v1268_v60 = vld [vmem:[%s1572_s9 + $0x30] sm:$0xff]   ;;  %v1269_v61 = vld [vmem:[%s1572_s9 + $0x28] sm:$0xff]   ;;  %p1336_p10 = scmp.ne.s32.totalorder %s908_s23, %s1335_s15  ;;  %p1343_p6 = scmp.lt.s32.totalorder %s1335_s15, %s1335_s15 }
 0x5c1   : > { %1157 = vmatpush3.bf16.msra.mxu1 %v1267_v59  ;;  %v1270_v62 = vld [vmem:[%s1572_s9 + $0x20] sm:$0xff]   ;;  %v1271_v63 = vld [vmem:[%s1572_s9 + $0x18] sm:$0xff]   ;;  %v1272_v0 = vld [vmem:[%s1572_s9 + $0x10] sm:$0xff]   ;;  %vm615_vm1 = vcmp.eq.s32.totalorder %v613_v6, %v614_v4 }
 0x5c2   : > { %1158 = vmatprep.subr.bf16.mxu1 %v1424_v50  ;;  %v1273_v1 = vld [vmem:[%s1572_s9 + $0x8] sm:$0xff]   ;;  %v1274_v2 = vld [vmem:[%s1572_s9] sm:$0xff]   ;;  %v610_v5 = vld [vmem:[#allocation2] sm:$0xff]  ;;  %s644_s9 = scalar_lea.vmem %s1762_s4, %s1409_s27  ;;  %s1779_s27 = sadd.s32 4294967295, %s1417_s29  }
 0x5c3   : > { %1139 = vmatpush3.bf16.msra.mxu0 %v1259_v51  ;;  %v611_v7 = vld [vmem:[#allocation2 + $0x8] sm:$0xff]  ;;  %v616_v8 = vsel %vm615_vm1, %v610_v5, 0.0  ;;  %v1035_v12 = vld [vmem:[%s644_s9] ss:$0 sm:$0xff]  ;;  %v874_v43 = vld [vmem:[#allocation8] sm:$0xff]  ;;  %p1725_p7 = scmp.eq.s32.totalorder %s1779_s27, 3  ;;  %p1344_p8 = por %p1343_p6, %p1342_p5 }
 0x5c4   : > { %1140 = vmatprep.subr.bf16.mxu0 %v1424_v50  ;;  %v617_v9 = vsel %vm615_vm1, %v611_v7, 0.0  ;;  %v619_v10 = vsel %vm618_vm0, %v616_v8, 0.0  ;;  %v1053_v41 = vld [vmem:[%s876_s19] ss:$0 sm:$0xff]  ;;  %v875_v24 = vld [vmem:[#allocation8 + $0x8] sm:$0xff] }
 0x5c5   : > { %1159 = vmatpush3.bf16.msra.mxu1 %v1268_v60  ;;  %620 = vadd.xlane.f32.xlu0 %v619_v10  ;;  %v622_v11 = vsel %vm618_vm0, %v617_v9, 0.0  ;;  %p1337_p3 = pnand %p1336_p10, %p1725_p7 }
 0x5c6   : > { %1160 = vmatprep.subr.bf16.mxu1 %v1424_v50 }
 0x5c7   : > { %1141 = vmatpush3.bf16.msra.mxu0 %v1260_v52  ;;  %p1338_p4 = pneg %p1337_p3 }
 0x5c8   : > { %1142 = vmatprep.subr.bf16.mxu0 %v1424_v50 }
 0x5c9   : > { %1161 = vmatpush3.bf16.msra.mxu1 %v1269_v61  ;;  %623 = vadd.xlane.f32.xlu0 %v622_v11  ;;  %p1345_p11 = pnand %p1344_p8, %p1338_p4 }
 0x5ca   : > { %1162 = vmatprep.subr.bf16.mxu1 %v1424_v50 }
 0x5cb   : > { %1143 = vmatpush3.bf16.msra.mxu0 %v1261_v53 }
 0x5cc   : > { %1144 = vmatprep.subr.bf16.mxu0 %v1424_v50 }
 0x5cd   : > { %1163 = vmatpush3.bf16.msra.mxu1 %v1270_v62 }
 0x5ce   : > { %1164 = vmatprep.subr.bf16.mxu1 %v1424_v50 }
 0x5cf   : > { %1145 = vmatpush3.bf16.msra.mxu0 %v1262_v54 }
 0x5d0   : > { %1146 = vmatprep.subr.bf16.mxu0 %v1424_v50 }
 0x5d1   : > { %1165 = vmatpush3.bf16.msra.mxu1 %v1271_v63 }
 0x5d2   : > { %1166 = vmatprep.subr.bf16.mxu1 %v1424_v50 }
 0x5d3   : > { %1147 = vmatpush3.bf16.msra.mxu0 %v1263_v55 }
 0x5d4   : > { %1148 = vmatprep.subr.bf16.mxu0 %v1424_v50 }
 0x5d5   : > { %1167 = vmatpush3.bf16.msra.mxu1 %v1272_v0 }
 0x5d6   : > { %1168 = vmatprep.subr.bf16.mxu1 %v1424_v50 }
 0x5d7   : > { %1149 = vmatpush3.bf16.msra.mxu0 %v1264_v56 }
 0x5d8   : > { %1150 = vmatprep.subr.bf16.mxu0 %v1424_v50 }
 0x5d9   : > { %1169 = vmatpush3.bf16.msra.mxu1 %v1273_v1 }
 0x5da   : > { %1170 = vmatprep.subr.bf16.mxu1 %v1424_v50 }
 0x5db   : > { %1151 = vmatpush3.bf16.msra.mxu0 %v1265_v57 }
 0x5dd   : > { %1171 = vmatpush3.bf16.msra.mxu1 %v1274_v2 }
 0x5de   : > { %1153 = vmatmul.mubr.bf16.vlgmr.msra.gmra.mxu0 %v1266_v58 }
 0x64e   : > { %v621_v40 = vpop.xlane.xlu0 %620 }
 0x64f   : > { %v884_v42 = vmul.f32 %v1053_v41, %v621_v40 }
 0x651   : > { %v886_v44 = vadd.f32 %v884_v42, %v874_v43 }
 0x652   : > { %v624_v23 = vpop.xlane.xlu0 %623 }
 0x653   : > { %v885_v45 = vmul.f32 %v1053_v41, %v624_v23 }
 0x655   : > { %v887_v49 = vadd.f32 %v885_v45, %v875_v24 }
 0x69e   : > { %v740_v13 = vpop.f32.mrf.mxu0 }
 0x69f   : > { %v741_v14 = vadd.f32 %v1035_v12, %v740_v13 }
 0x6a0   : > { %v1154_v15 = vpop.f32.mrf.mxu0 }
 0x6a1   : > { %v747_v16 = vmul.f32 %v741_v14, %v741_v14 }
 0x6a2   : > { %v743_v17 = vpop.f32.mrf.mxu0 }
 0x6a3   : > { %v749_v18 = vmul.f32 %v747_v16, %v741_v14  ;;  %v744_v19 = vadd.f32 %v1035_v12, %v743_v17 }
 0x6a4   : > { %v1155_v20 = vpop.f32.mrf.mxu0 }
 0x6a5   : > { %v751_v21 = vmul.f32 0.044715, %v749_v18  ;;  %v748_v22 = vmul.f32 %v744_v19, %v744_v19 }
 0x6a7   : > { %v753_v25 = vadd.f32 %v751_v21, %v741_v14  ;;  %v750_v26 = vmul.f32 %v748_v22, %v744_v19 }
 0x6a9   : > { %v755_v27 = vmul.f32 0.7978846, %v753_v25  ;;  %v752_v29 = vmul.f32 0.044715, %v750_v26 }
 0x6ab   : > { %1275 = vtanh.f32 %v755_v27  ;;  %v754_v30 = vadd.f32 %v752_v29, %v744_v19 }
 0x6ad   : > { %v756_v31 = vmul.f32 0.7978846, %v754_v30 }
 0x6af   : > { %1277 = vtanh.f32 %v756_v31 }
 0x6b8   : > { %v1276_v32 = vpop.eup %1275 }
 0x6b9   : > { %v759_v33 = vadd.f32 1.0, %v1276_v32 }
 0x6bb   : > { %v761_v36 = vmul.f32 0.5, %v759_v33 }
 0x6bc   : > { %v1278_v34 = vpop.eup %1277 }
 0x6bd   : > { %v760_v35 = vadd.f32 1.0, %v1278_v34  ;;  %v763_v38 = vmul.f32 %v761_v36, %v741_v14 }
 0x6bf   : > { %v762_v37 = vmul.f32 0.5, %v760_v35 }
 0x6c1   : > { %v764_v28 = vmul.f32 %v762_v37, %v744_v19 }
 0x6c3   : > { %v765_v39 = vpack.c.bf16 %v764_v28, %v763_v38 }
 0x6c5   : > { %1173 = vmatmul.mubr.bf16.vlgmr.msra.gmra.mxu1 %v765_v39 }
 0x785   : > { %v864_v46 = vpop.f32.mrf.mxu1 }
 0x786   : > { %v892_v47 = vmul.f32 %v864_v46, %v621_v40 }
 0x787   : > { %v1174_v48 = vpop.f32.mrf.mxu1 }
 0x788   : > { %v894_v50 = vadd.f32 %v892_v47, %v886_v44 }
 0x789   : > { %v867_v51 = vpop.f32.mrf.mxu1 }
 0x78a   : > { %896 = vst [vmem:[#allocation8] sm:$0xff] %v894_v50  ;;  %v893_v52 = vmul.f32 %v867_v51, %v624_v23 }
 0x78b   : > { %v1175_v53 = vpop.f32.mrf.mxu1 }
 0x78c   : > { %v895_v54 = vadd.f32 %v893_v52, %v887_v49 }
 0x78e   : > { %897 = vst [vmem:[#allocation8 + $0x8] sm:$0xff] %v895_v54 }
 0x78f   : > { %1348 = shalt.err (!%p1345_p11)
}
 0x790   : > { %s1427_s16 = smov 128   ;;  %s1428_s8 = smov 8  }
 0x791   : > { %1181 = dma.vmem_to_hbm [thread:$0]  (%p1725_p7), %s908_s23, 256, %s1765_s7, [#allocation5], %s1427_s16, %s1427_s16, %s1428_s8  }
 0x792   : > { %1392 = dma.done.wait (%p1725_p7), [#allocation5], 256  }
 0x793   : > { %1394 = vsyncadd (%p1725_p7), [#allocation5], 4294967040 }
 0x794 PF: > { %s24_s29 = sadd.s32 1, %s1417_s29   ;;  %s1781_s22 = sld [smem:[#allocation12_spill]] }
 0x795   : > { %p21_p12 = scmp.ge.s32.totalorder %s24_s29, 6   ;;  %s1782_s24 = smov %s1401_s25 }
 0x796   : > { %s1783_s25 = smov %s1405_s26  ;;  %s1784_s26 = smov %s1520_s13 }
 0x797   : > { %s1785_s27 = smov %s1413_s28  ;;  %23 = sbr.rel (!%p21_p12) target bundleno = 9 (0x9), region = 112 }
 0x79a   : > { %s1786_s28 = smov %s1781_s22 }
 0x79c   :  { %923 = vsyncpa [#allocation4], 1 }
 0x79d   :  { %925 = vsyncpa [#allocation4 + $0x1], 1 }
 0x79e   :  { %926 = vsyncpa [#allocation7], 1 }
 0x79f   :  { %928 = vsyncpa [#allocation7 + $0x1], 1 }
 0x7a0   :  { %929 = vsyncpa [#allocation5], 1 }
 0x7a1   :  { %931 = vsyncpa [#allocation5 + $0x1], 1 }

</bundles_post_ra>
